<compile_context>
chip_gen: v6e
topology: v6e:2x2x1
jax: 0.10.0
libtpu: 0.0.40
codegen_flags: <defaults>
</compile_context>

<pallas_src>
import jax
import jax.numpy as jnp
import numpy as np
from jax.experimental import pallas as pl
from jax.experimental.pallas import tpu as pltpu

_LANE = 128  # MXU/vreg lane width; the im2col K axis is zero-padded to this.


def _make_kernel(H, W):
    HW = H * W

    def kernel(x_ref, w1_ref, w2_ref, pos_ref, o_ref, col_ref):
        """Fused conv3x3(reflect)+BN+LeakyReLU x2 for one batch element.

        x_ref  : (1, Cin, HW)   input, channels-major, spatial on lanes
        w1_ref : (Cout, 128)    layer-1 weights: col k = (ky*3+kx)*Cin + cin with BN
                                scale folded in; folded BN bias at col 9*Cin; rest 0
        w2_ref : (Cout, 128)    layer-2 weights (bias at col 9*Cout)
        pos_ref: (2, HW) int32  row 0 = w index, row 1 = h index of each pixel
        o_ref  : (1, Cout, HW)  output (lane-dense)
        col_ref: VMEM (128, HW) shared im2col scratch (K on sublanes)
        """
        Cin = x_ref.shape[1]
        Cout = o_ref.shape[1]

        wcol = pos_ref[0:1, :]
        hrow = pos_ref[1:2, :]
        w_lo = wcol == 0
        w_hi = wcol == (W - 1)
        h_lo = hrow == 0
        h_hi = hrow == (H - 1)

        def im2col(slab, C):
            # Reflect-padded 3x3 neighbourhoods of the (C, HW) slab -> rows [0, 9*C)
            # of col_ref.  All shifts are XLU lane rotations; the wrap-around /
            # cross-row values land exactly where the jnp.where fixups overwrite.
            r_e = pltpu.roll(slab, HW - 1, axis=1)     # value at (h, w+1)
            r_w = pltpu.roll(slab, 1, axis=1)          # value at (h, w-1)
            cols = (
                jnp.where(w_lo, r_e, r_w),             # dx = -1 (reflect at w=0)
                slab,                                  # dx =  0
                jnp.where(w_hi, r_w, r_e),             # dx = +1 (reflect at w=W-1)
            )
            for j, sdx in enumerate(cols):
                r_s = pltpu.roll(sdx, HW - W, axis=1)  # value at (h+1, .)
                r_n = pltpu.roll(sdx, W, axis=1)       # value at (h-1, .)
                rows = (
                    jnp.where(h_lo, r_s, r_n),         # dy = -1 (reflect at h=0)
                    sdx,                               # dy =  0
                    jnp.where(h_hi, r_n, r_s),         # dy = +1 (reflect at h=H-1)
                )
                for i, tap in enumerate(rows):
                    t = i * 3 + j                      # matches weight col (ky*3+kx)
                    col_ref[t * C:(t + 1) * C, :] = tap.astype(jnp.float32)

        # Zero only the dead K rows; all live rows are fully overwritten below.
        zstart = (9 * Cin) // 8 * 8
        col_ref[zstart:, :] = jnp.zeros((_LANE - zstart, HW), jnp.float32)
        ones_row = jnp.ones((1, HW), jnp.float32)

        # ---- layer 1: conv3x3(reflect) -> folded BN -> LeakyReLU(0.01) ----
        im2col(x_ref[0], Cin)
        col_ref[9 * Cin:9 * Cin + 1, :] = ones_row            # bias row
        y1 = jnp.dot(w1_ref[...], col_ref[...],
                     preferred_element_type=jnp.float32)       # (Cout, HW)
        y1 = jnp.where(y1 > 0, y1, 0.01 * y1)
        # TODO(synk): Dropout2d is identity in eval mode (implemented as identity).

        # ---- layer 2: intermediate stays in vregs/VMEM, never touches HBM ----
        im2col(y1, Cout)
        col_ref[9 * Cout:9 * Cout + 1, :] = ones_row           # bias row
        y2 = jnp.dot(w2_ref[...], col_ref[...],
                     preferred_element_type=jnp.float32)       # (Cout, HW)
        y2 = jnp.where(y2 > 0, y2, 0.01 * y2)
        o_ref[0] = y2.astype(o_ref.dtype)                      # dense 256-lane store

    return kernel


def conv_block_forward(x_nchw, params):
    """Conv_Block.forward: NCHW in, NCHW out (kernel works channels-major)."""
    N, Cin, H, W = x_nchw.shape
    Cout = params["w2"].shape[0]
    HW = H * W
    assert H >= 2 and W >= 2, "reflect padding requires H, W >= 2"
    assert 9 * Cin + 1 <= _LANE and 9 * Cout + 1 <= _LANE

    x_flat = x_nchw.reshape(N, Cin, HW)                        # no transposes anywhere

    # Per-pixel (w, h) indices for the reflect edge fixups (tiny, computed once).
    wcol = jnp.tile(jnp.arange(W, dtype=jnp.int32), H)
    hrow = jnp.repeat(jnp.arange(H, dtype=jnp.int32), W)
    pos = jnp.stack([wcol, hrow], axis=0)                      # (2, HW)

    out_flat = pl.pallas_call(
        _make_kernel(H, W),
        out_shape=jax.ShapeDtypeStruct((N, Cout, HW), x_nchw.dtype),
        grid_spec=pltpu.PrefetchScalarGridSpec(
            num_scalar_prefetch=0,
            grid=(N,),
            in_specs=[
                pl.BlockSpec((1, Cin, HW), lambda n: (n, 0, 0)),
                pl.BlockSpec((Cout, _LANE), lambda n: (0, 0)),
                pl.BlockSpec((Cout, _LANE), lambda n: (0, 0)),
                pl.BlockSpec((2, HW), lambda n: (0, 0)),
            ],
            out_specs=pl.BlockSpec((1, Cout, HW), lambda n: (n, 0, 0)),
            scratch_shapes=[pltpu.VMEM((_LANE, HW), jnp.float32)],  # shared im2col
        ),
        compiler_params=pltpu.CompilerParams(
            dimension_semantics=("parallel",)),                # 1 batch elem per v7x TC
    )(x_flat, params["w1"], params["w2"], pos)

    return out_flat.reshape(N, Cout, H, W)                     # already NCHW-flat


def _fold_conv_bn(w_oihw, gamma, beta, mean, var, eps=1e-5):
    """Fold eval-mode BatchNorm (scale AND bias) into one (Cout, 128) matrix.

    Column k = (ky*3+kx)*Cin + cin holds scale[co]*w[co, cin, ky, kx]; column
    9*Cin holds the folded bias (it multiplies an all-ones im2col row); remaining
    columns are zero so K is a full 128-lane tile.
    """
    cout, cin = w_oihw.shape[0], w_oihw.shape[1]
    scale = gamma / jnp.sqrt(var + eps)
    bias = beta - mean * scale
    w = jnp.transpose(w_oihw, (0, 2, 3, 1)).reshape(cout, 9 * cin) * scale[:, None]
    wp = jnp.zeros((cout, _LANE), jnp.float32)
    wp = wp.at[:, :9 * cin].set(w.astype(jnp.float32))
    wp = wp.at[:, 9 * cin].set(bias.astype(jnp.float32))
    return wp


def make_params(w1_oihw, bn1, w2_oihw, bn2, eps=1e-5):
    return dict(w1=_fold_conv_bn(w1_oihw, *bn1, eps=eps),
                w2=_fold_conv_bn(w2_oihw, *bn2, eps=eps))


def _ref_layer(x_nhwc, w_oihw, gamma, beta, mean, var, eps=1e-5):
    """Pure-JAX reference: conv3x3(reflect) -> eval BN -> LeakyReLU(0.01)."""
    w_hwio = jnp.transpose(w_oihw, (2, 3, 1, 0))
    xp = jnp.pad(x_nhwc, ((0, 0), (1, 1), (1, 1), (0, 0)), mode="reflect")
    y = jax.lax.conv_general_dilated(
        xp, w_hwio, window_strides=(1, 1), padding="VALID",
        dimension_numbers=("NHWC", "HWIO", "NHWC"))
    scale = gamma / jnp.sqrt(var + eps)
    bias = beta - mean * scale
    y = y * scale.reshape(1, 1, 1, -1) + bias.reshape(1, 1, 1, -1)
    return jnp.where(y > 0, y, 0.01 * y)


if __name__ == "__main__":
    in_channel, out_channel = 4, 8
    N, H, W = 2, 16, 16

    key = jax.random.PRNGKey(0)
    ks = jax.random.split(key, 11)

    # Input in the PyTorch NCHW convention.
    x_nchw = jax.random.normal(ks[0], (N, in_channel, H, W), jnp.float32)

    # Conv weights in PyTorch OIHW layout.
    w1_oihw = 0.1 * jax.random.normal(ks[1], (out_channel, in_channel, 3, 3), jnp.float32)
    w2_oihw = 0.1 * jax.random.normal(ks[2], (out_channel, out_channel, 3, 3), jnp.float32)

    # Deterministic (non-trivial) BatchNorm parameters / running stats.
    gamma1 = jax.random.uniform(ks[3], (out_channel,), jnp.float32, 0.5, 1.5)
    beta1 = 0.1 * jax.random.normal(ks[4], (out_channel,), jnp.float32)
    mean1 = 0.1 * jax.random.normal(ks[5], (out_channel,), jnp.float32)
    var1 = jax.random.uniform(ks[6], (out_channel,), jnp.float32, 0.5, 1.5)
    gamma2 = jax.random.uniform(ks[7], (out_channel,), jnp.float32, 0.5, 1.5)
    beta2 = 0.1 * jax.random.normal(ks[8], (out_channel,), jnp.float32)
    mean2 = 0.1 * jax.random.normal(ks[9], (out_channel,), jnp.float32)
    var2 = jax.random.uniform(ks[10], (out_channel,), jnp.float32, 0.5, 1.5)

    params = make_params(w1_oihw, (gamma1, beta1, mean1, var1),
                         w2_oihw, (gamma2, beta2, mean2, var2))

    out = jax.jit(conv_block_forward)(x_nchw, params)
    out = jax.block_until_ready(out)

    # Validate against a pure-JAX reference.
    x_nhwc = jnp.transpose(x_nchw, (0, 2, 3, 1))
    ref = _ref_layer(x_nhwc, w1_oihw, gamma1, beta1, mean1, var1)
    ref = _ref_layer(ref, w2_oihw, gamma2, beta2, mean2, var2)
    ref = jnp.transpose(ref, (0, 3, 1, 2))

    assert out.shape == (N, out_channel, H, W), out.shape
    np.testing.assert_allclose(np.asarray(out), np.asarray(ref), rtol=1e-4, atol=1e-4)

    print("KERNEL_OK")
</pallas_src>

<mosaic_0001>
module attributes {stable_mosaic.version = 11 : i64} {
  func.func @kernel(%arg0: i32, %arg1: memref<1x4x256xf32, #tpu.memory_space<vmem>>, %arg2: memref<8x128xf32, #tpu.memory_space<vmem>>, %arg3: memref<8x128xf32, #tpu.memory_space<vmem>>, %arg4: memref<2x256xi32, #tpu.memory_space<vmem>>, %arg5: memref<1x8x256xf32, #tpu.memory_space<vmem>>, %arg6: memref<128x256xf32, #tpu.memory_space<vmem>>) attributes {dimension_semantics = [#tpu.dimension_semantics<parallel>], iteration_bounds = array<i64: 2>, scalar_prefetch = 0 : i64, scratch_operands = 1 : i64, tpu.core_type = #tpu.core_type<tc>, window_params = [{transform_indices = @transform_0, window_bounds = array<i64: 1, 4, 256>}, {pipeline_mode = #tpu.pipeline_mode<synchronous>, transform_indices = @transform_1, window_bounds = array<i64: 8, 128>}, {pipeline_mode = #tpu.pipeline_mode<synchronous>, transform_indices = @transform_2, window_bounds = array<i64: 8, 128>}, {pipeline_mode = #tpu.pipeline_mode<synchronous>, transform_indices = @transform_3, window_bounds = array<i64: 2, 256>}, {transform_indices = @transform_4, window_bounds = array<i64: 1, 8, 256>}]} {
    %c0 = arith.constant 0 : index
    %c0_0 = arith.constant 0 : index
    %0 = vector.load %arg4[%c0, %c0_0] : memref<2x256xi32, #tpu.memory_space<vmem>>, vector<1x256xi32>
    %c1 = arith.constant 1 : index
    %c0_1 = arith.constant 0 : index
    %1 = vector.load %arg4[%c1, %c0_1] : memref<2x256xi32, #tpu.memory_space<vmem>>, vector<1x256xi32>
    %c0_i32 = arith.constant 0 : i32
    %2 = vector.broadcast %c0_i32 : i32 to vector<1x256xi32>
    %3 = arith.cmpi eq, %0, %2 : vector<1x256xi32>
    %c15_i32 = arith.constant 15 : i32
    %4 = vector.broadcast %c15_i32 : i32 to vector<1x256xi32>
    %5 = arith.cmpi eq, %0, %4 : vector<1x256xi32>
    %c0_i32_2 = arith.constant 0 : i32
    %6 = vector.broadcast %c0_i32_2 : i32 to vector<1x256xi32>
    %7 = arith.cmpi eq, %1, %6 : vector<1x256xi32>
    %c15_i32_3 = arith.constant 15 : i32
    %8 = vector.broadcast %c15_i32_3 : i32 to vector<1x256xi32>
    %9 = arith.cmpi eq, %1, %8 : vector<1x256xi32>
    %cst = arith.constant 0.000000e+00 : f32
    %10 = vector.broadcast %cst : f32 to vector<96x256xf32>
    %c32 = arith.constant 32 : index
    %c0_4 = arith.constant 0 : index
    %11 = vector.load %arg6[%c32, %c0_4] : memref<128x256xf32, #tpu.memory_space<vmem>>, vector<96x256xf32>
    tpu.vector_store %arg6[%c32, %c0_4], %10 {strides = array<i32>} : memref<128x256xf32, #tpu.memory_space<vmem>>, vector<96x256xf32>,
    %cst_5 = arith.constant 1.000000e+00 : f32
    %12 = vector.broadcast %cst_5 : f32 to vector<1x256xf32>
    %c0_6 = arith.constant 0 : index
    %c0_7 = arith.constant 0 : index
    %c0_8 = arith.constant 0 : index
    %13 = vector.load %arg1[%c0_6, %c0_7, %c0_8] : memref<1x4x256xf32, #tpu.memory_space<vmem>>, vector<1x4x256xf32>
    %14 = vector.shape_cast %13 : vector<1x4x256xf32> to vector<4x256xf32>
    %c255_i32 = arith.constant 255 : i32
    %15 = tpu.dynamic_rotate %14 by %c255_i32 dim 1 : vector<4x256xf32>, i32 -> vector<4x256xf32>
    %c1_i32 = arith.constant 1 : i32
    %16 = tpu.dynamic_rotate %14 by %c1_i32 dim 1 : vector<4x256xf32>, i32 -> vector<4x256xf32>
    %17 = vector.shape_cast %3 : vector<1x256xi1> to vector<1x256xi1>
    %18 = vector.broadcast %17 : vector<1x256xi1> to vector<4x256xi1>
    %19 = arith.select %18, %15, %16 : vector<4x256xi1>, vector<4x256xf32>
    %20 = vector.shape_cast %5 : vector<1x256xi1> to vector<1x256xi1>
    %21 = vector.broadcast %20 : vector<1x256xi1> to vector<4x256xi1>
    %22 = arith.select %21, %16, %15 : vector<4x256xi1>, vector<4x256xf32>
    %c240_i32 = arith.constant 240 : i32
    %23 = tpu.dynamic_rotate %19 by %c240_i32 dim 1 : vector<4x256xf32>, i32 -> vector<4x256xf32>
    %c16_i32 = arith.constant 16 : i32
    %24 = tpu.dynamic_rotate %19 by %c16_i32 dim 1 : vector<4x256xf32>, i32 -> vector<4x256xf32>
    %25 = vector.shape_cast %7 : vector<1x256xi1> to vector<1x256xi1>
    %26 = vector.broadcast %25 : vector<1x256xi1> to vector<4x256xi1>
    %27 = arith.select %26, %23, %24 : vector<4x256xi1>, vector<4x256xf32>
    %28 = vector.shape_cast %9 : vector<1x256xi1> to vector<1x256xi1>
    %29 = vector.broadcast %28 : vector<1x256xi1> to vector<4x256xi1>
    %30 = arith.select %29, %24, %23 : vector<4x256xi1>, vector<4x256xf32>
    %c0_9 = arith.constant 0 : index
    %c0_10 = arith.constant 0 : index
    %31 = vector.load %arg6[%c0_9, %c0_10] : memref<128x256xf32, #tpu.memory_space<vmem>>, vector<4x256xf32>
    tpu.vector_store %arg6[%c0_9, %c0_10], %27 {strides = array<i32>} : memref<128x256xf32, #tpu.memory_space<vmem>>, vector<4x256xf32>,
    %c12 = arith.constant 12 : index
    %c0_11 = arith.constant 0 : index
    %32 = vector.load %arg6[%c12, %c0_11] : memref<128x256xf32, #tpu.memory_space<vmem>>, vector<4x256xf32>
    tpu.vector_store %arg6[%c12, %c0_11], %19 {strides = array<i32>} : memref<128x256xf32, #tpu.memory_space<vmem>>, vector<4x256xf32>,
    %c24 = arith.constant 24 : index
    %c0_12 = arith.constant 0 : index
    %33 = vector.load %arg6[%c24, %c0_12] : memref<128x256xf32, #tpu.memory_space<vmem>>, vector<4x256xf32>
    tpu.vector_store %arg6[%c24, %c0_12], %30 {strides = array<i32>} : memref<128x256xf32, #tpu.memory_space<vmem>>, vector<4x256xf32>,
    %c240_i32_13 = arith.constant 240 : i32
    %34 = tpu.dynamic_rotate %14 by %c240_i32_13 dim 1 : vector<4x256xf32>, i32 -> vector<4x256xf32>
    %c16_i32_14 = arith.constant 16 : i32
    %35 = tpu.dynamic_rotate %14 by %c16_i32_14 dim 1 : vector<4x256xf32>, i32 -> vector<4x256xf32>
    %36 = vector.shape_cast %7 : vector<1x256xi1> to vector<1x256xi1>
    %37 = vector.broadcast %36 : vector<1x256xi1> to vector<4x256xi1>
    %38 = arith.select %37, %34, %35 : vector<4x256xi1>, vector<4x256xf32>
    %39 = vector.shape_cast %9 : vector<1x256xi1> to vector<1x256xi1>
    %40 = vector.broadcast %39 : vector<1x256xi1> to vector<4x256xi1>
    %41 = arith.select %40, %35, %34 : vector<4x256xi1>, vector<4x256xf32>
    %c4 = arith.constant 4 : index
    %c0_15 = arith.constant 0 : index
    %42 = vector.load %arg6[%c4, %c0_15] : memref<128x256xf32, #tpu.memory_space<vmem>>, vector<4x256xf32>
    tpu.vector_store %arg6[%c4, %c0_15], %38 {strides = array<i32>} : memref<128x256xf32, #tpu.memory_space<vmem>>, vector<4x256xf32>,
    %c16 = arith.constant 16 : index
    %c0_16 = arith.constant 0 : index
    %43 = vector.load %arg6[%c16, %c0_16] : memref<128x256xf32, #tpu.memory_space<vmem>>, vector<4x256xf32>
    tpu.vector_store %arg6[%c16, %c0_16], %14 {strides = array<i32>} : memref<128x256xf32, #tpu.memory_space<vmem>>, vector<4x256xf32>,
    %c28 = arith.constant 28 : index
    %c0_17 = arith.constant 0 : index
    %44 = vector.load %arg6[%c28, %c0_17] : memref<128x256xf32, #tpu.memory_space<vmem>>, vector<4x256xf32>
    tpu.vector_store %arg6[%c28, %c0_17], %41 {strides = array<i32>} : memref<128x256xf32, #tpu.memory_space<vmem>>, vector<4x256xf32>,
    %c240_i32_18 = arith.constant 240 : i32
    %45 = tpu.dynamic_rotate %22 by %c240_i32_18 dim 1 : vector<4x256xf32>, i32 -> vector<4x256xf32>
    %c16_i32_19 = arith.constant 16 : i32
    %46 = tpu.dynamic_rotate %22 by %c16_i32_19 dim 1 : vector<4x256xf32>, i32 -> vector<4x256xf32>
    %47 = vector.shape_cast %7 : vector<1x256xi1> to vector<1x256xi1>
    %48 = vector.broadcast %47 : vector<1x256xi1> to vector<4x256xi1>
    %49 = arith.select %48, %45, %46 : vector<4x256xi1>, vector<4x256xf32>
    %50 = vector.shape_cast %9 : vector<1x256xi1> to vector<1x256xi1>
    %51 = vector.broadcast %50 : vector<1x256xi1> to vector<4x256xi1>
    %52 = arith.select %51, %46, %45 : vector<4x256xi1>, vector<4x256xf32>
    %c8 = arith.constant 8 : index
    %c0_20 = arith.constant 0 : index
    %53 = vector.load %arg6[%c8, %c0_20] : memref<128x256xf32, #tpu.memory_space<vmem>>, vector<4x256xf32>
    tpu.vector_store %arg6[%c8, %c0_20], %49 {strides = array<i32>} : memref<128x256xf32, #tpu.memory_space<vmem>>, vector<4x256xf32>,
    %c20 = arith.constant 20 : index
    %c0_21 = arith.constant 0 : index
    %54 = vector.load %arg6[%c20, %c0_21] : memref<128x256xf32, #tpu.memory_space<vmem>>, vector<4x256xf32>
    tpu.vector_store %arg6[%c20, %c0_21], %22 {strides = array<i32>} : memref<128x256xf32, #tpu.memory_space<vmem>>, vector<4x256xf32>,
    %c32_22 = arith.constant 32 : index
    %c0_23 = arith.constant 0 : index
    %55 = vector.load %arg6[%c32_22, %c0_23] : memref<128x256xf32, #tpu.memory_space<vmem>>, vector<4x256xf32>
    tpu.vector_store %arg6[%c32_22, %c0_23], %52 {strides = array<i32>} : memref<128x256xf32, #tpu.memory_space<vmem>>, vector<4x256xf32>,
    %c36 = arith.constant 36 : index
    %c0_24 = arith.constant 0 : index
    %56 = vector.load %arg6[%c36, %c0_24] : memref<128x256xf32, #tpu.memory_space<vmem>>, vector<1x256xf32>
    tpu.vector_store %arg6[%c36, %c0_24], %12 {strides = array<i32>} : memref<128x256xf32, #tpu.memory_space<vmem>>, vector<1x256xf32>,
    %c0_25 = arith.constant 0 : index
    %c0_26 = arith.constant 0 : index
    %57 = vector.load %arg2[%c0_25, %c0_26] : memref<8x128xf32, #tpu.memory_space<vmem>>, vector<8x128xf32>
    %c0_27 = arith.constant 0 : index
    %c0_28 = arith.constant 0 : index
    %58 = vector.load %arg6[%c0_27, %c0_28] : memref<128x256xf32, #tpu.memory_space<vmem>>, vector<128x256xf32>
    %cst_29 = arith.constant dense<0.000000e+00> : vector<8x256xf32>
    %59 = tpu.matmul %57, %58, %cst_29 {dimension_numbers = #tpu.dot_dimension_numbers<[1], [0], [0], [1], [0, 0, 1, 1], [], []>} : vector<8x128xf32>, vector<128x256xf32>, vector<8x256xf32> -> vector<8x256xf32>
    %cst_30 = arith.constant 0.000000e+00 : f32
    %60 = vector.broadcast %cst_30 : f32 to vector<8x256xf32>
    %61 = arith.cmpf ogt, %59, %60 : vector<8x256xf32>
    %cst_31 = arith.constant 0.00999999977 : f32
    %62 = vector.broadcast %cst_31 : f32 to vector<8x256xf32>
    %63 = arith.mulf %62, %59 : vector<8x256xf32>
    %64 = arith.select %61, %59, %63 : vector<8x256xi1>, vector<8x256xf32>
    %c255_i32_32 = arith.constant 255 : i32
    %65 = tpu.dynamic_rotate %64 by %c255_i32_32 dim 1 : vector<8x256xf32>, i32 -> vector<8x256xf32>
    %c1_i32_33 = arith.constant 1 : i32
    %66 = tpu.dynamic_rotate %64 by %c1_i32_33 dim 1 : vector<8x256xf32>, i32 -> vector<8x256xf32>
    %67 = vector.shape_cast %3 : vector<1x256xi1> to vector<1x256xi1>
    %68 = vector.broadcast %67 : vector<1x256xi1> to vector<8x256xi1>
    %69 = arith.select %68, %65, %66 : vector<8x256xi1>, vector<8x256xf32>
    %70 = vector.shape_cast %5 : vector<1x256xi1> to vector<1x256xi1>
    %71 = vector.broadcast %70 : vector<1x256xi1> to vector<8x256xi1>
    %72 = arith.select %71, %66, %65 : vector<8x256xi1>, vector<8x256xf32>
    %c240_i32_34 = arith.constant 240 : i32
    %73 = tpu.dynamic_rotate %69 by %c240_i32_34 dim 1 : vector<8x256xf32>, i32 -> vector<8x256xf32>
    %c16_i32_35 = arith.constant 16 : i32
    %74 = tpu.dynamic_rotate %69 by %c16_i32_35 dim 1 : vector<8x256xf32>, i32 -> vector<8x256xf32>
    %75 = vector.shape_cast %7 : vector<1x256xi1> to vector<1x256xi1>
    %76 = vector.broadcast %75 : vector<1x256xi1> to vector<8x256xi1>
    %77 = arith.select %76, %73, %74 : vector<8x256xi1>, vector<8x256xf32>
    %78 = vector.shape_cast %9 : vector<1x256xi1> to vector<1x256xi1>
    %79 = vector.broadcast %78 : vector<1x256xi1> to vector<8x256xi1>
    %80 = arith.select %79, %74, %73 : vector<8x256xi1>, vector<8x256xf32>
    %c0_36 = arith.constant 0 : index
    %c0_37 = arith.constant 0 : index
    %81 = vector.load %arg6[%c0_36, %c0_37] : memref<128x256xf32, #tpu.memory_space<vmem>>, vector<8x256xf32>
    tpu.vector_store %arg6[%c0_36, %c0_37], %77 {strides = array<i32>} : memref<128x256xf32, #tpu.memory_space<vmem>>, vector<8x256xf32>,
    %c24_38 = arith.constant 24 : index
    %c0_39 = arith.constant 0 : index
    %82 = vector.load %arg6[%c24_38, %c0_39] : memref<128x256xf32, #tpu.memory_space<vmem>>, vector<8x256xf32>
    tpu.vector_store %arg6[%c24_38, %c0_39], %69 {strides = array<i32>} : memref<128x256xf32, #tpu.memory_space<vmem>>, vector<8x256xf32>,
    %c48 = arith.constant 48 : index
    %c0_40 = arith.constant 0 : index
    %83 = vector.load %arg6[%c48, %c0_40] : memref<128x256xf32, #tpu.memory_space<vmem>>, vector<8x256xf32>
    tpu.vector_store %arg6[%c48, %c0_40], %80 {strides = array<i32>} : memref<128x256xf32, #tpu.memory_space<vmem>>, vector<8x256xf32>,
    %c240_i32_41 = arith.constant 240 : i32
    %84 = tpu.dynamic_rotate %64 by %c240_i32_41 dim 1 : vector<8x256xf32>, i32 -> vector<8x256xf32>
    %c16_i32_42 = arith.constant 16 : i32
    %85 = tpu.dynamic_rotate %64 by %c16_i32_42 dim 1 : vector<8x256xf32>, i32 -> vector<8x256xf32>
    %86 = vector.shape_cast %7 : vector<1x256xi1> to vector<1x256xi1>
    %87 = vector.broadcast %86 : vector<1x256xi1> to vector<8x256xi1>
    %88 = arith.select %87, %84, %85 : vector<8x256xi1>, vector<8x256xf32>
    %89 = vector.shape_cast %9 : vector<1x256xi1> to vector<1x256xi1>
    %90 = vector.broadcast %89 : vector<1x256xi1> to vector<8x256xi1>
    %91 = arith.select %90, %85, %84 : vector<8x256xi1>, vector<8x256xf32>
    %c8_43 = arith.constant 8 : index
    %c0_44 = arith.constant 0 : index
    %92 = vector.load %arg6[%c8_43, %c0_44] : memref<128x256xf32, #tpu.memory_space<vmem>>, vector<8x256xf32>
    tpu.vector_store %arg6[%c8_43, %c0_44], %88 {strides = array<i32>} : memref<128x256xf32, #tpu.memory_space<vmem>>, vector<8x256xf32>,
    %c32_45 = arith.constant 32 : index
    %c0_46 = arith.constant 0 : index
    %93 = vector.load %arg6[%c32_45, %c0_46] : memref<128x256xf32, #tpu.memory_space<vmem>>, vector<8x256xf32>
    tpu.vector_store %arg6[%c32_45, %c0_46], %64 {strides = array<i32>} : memref<128x256xf32, #tpu.memory_space<vmem>>, vector<8x256xf32>,
    %c56 = arith.constant 56 : index
    %c0_47 = arith.constant 0 : index
    %94 = vector.load %arg6[%c56, %c0_47] : memref<128x256xf32, #tpu.memory_space<vmem>>, vector<8x256xf32>
    tpu.vector_store %arg6[%c56, %c0_47], %91 {strides = array<i32>} : memref<128x256xf32, #tpu.memory_space<vmem>>, vector<8x256xf32>,
    %c240_i32_48 = arith.constant 240 : i32
    %95 = tpu.dynamic_rotate %72 by %c240_i32_48 dim 1 : vector<8x256xf32>, i32 -> vector<8x256xf32>
    %c16_i32_49 = arith.constant 16 : i32
    %96 = tpu.dynamic_rotate %72 by %c16_i32_49 dim 1 : vector<8x256xf32>, i32 -> vector<8x256xf32>
    %97 = vector.shape_cast %7 : vector<1x256xi1> to vector<1x256xi1>
    %98 = vector.broadcast %97 : vector<1x256xi1> to vector<8x256xi1>
    %99 = arith.select %98, %95, %96 : vector<8x256xi1>, vector<8x256xf32>
    %100 = vector.shape_cast %9 : vector<1x256xi1> to vector<1x256xi1>
    %101 = vector.broadcast %100 : vector<1x256xi1> to vector<8x256xi1>
    %102 = arith.select %101, %96, %95 : vector<8x256xi1>, vector<8x256xf32>
    %c16_50 = arith.constant 16 : index
    %c0_51 = arith.constant 0 : index
    %103 = vector.load %arg6[%c16_50, %c0_51] : memref<128x256xf32, #tpu.memory_space<vmem>>, vector<8x256xf32>
    tpu.vector_store %arg6[%c16_50, %c0_51], %99 {strides = array<i32>} : memref<128x256xf32, #tpu.memory_space<vmem>>, vector<8x256xf32>,
    %c40 = arith.constant 40 : index
    %c0_52 = arith.constant 0 : index
    %104 = vector.load %arg6[%c40, %c0_52] : memref<128x256xf32, #tpu.memory_space<vmem>>, vector<8x256xf32>
    tpu.vector_store %arg6[%c40, %c0_52], %72 {strides = array<i32>} : memref<128x256xf32, #tpu.memory_space<vmem>>, vector<8x256xf32>,
    %c64 = arith.constant 64 : index
    %c0_53 = arith.constant 0 : index
    %105 = vector.load %arg6[%c64, %c0_53] : memref<128x256xf32, #tpu.memory_space<vmem>>, vector<8x256xf32>
    tpu.vector_store %arg6[%c64, %c0_53], %102 {strides = array<i32>} : memref<128x256xf32, #tpu.memory_space<vmem>>, vector<8x256xf32>,
    %c72 = arith.constant 72 : index
    %c0_54 = arith.constant 0 : index
    %106 = vector.load %arg6[%c72, %c0_54] : memref<128x256xf32, #tpu.memory_space<vmem>>, vector<1x256xf32>
    tpu.vector_store %arg6[%c72, %c0_54], %12 {strides = array<i32>} : memref<128x256xf32, #tpu.memory_space<vmem>>, vector<1x256xf32>,
    %c0_55 = arith.constant 0 : index
    %c0_56 = arith.constant 0 : index
    %107 = vector.load %arg3[%c0_55, %c0_56] : memref<8x128xf32, #tpu.memory_space<vmem>>, vector<8x128xf32>
    %c0_57 = arith.constant 0 : index
    %c0_58 = arith.constant 0 : index
    %108 = vector.load %arg6[%c0_57, %c0_58] : memref<128x256xf32, #tpu.memory_space<vmem>>, vector<128x256xf32>
    %cst_59 = arith.constant dense<0.000000e+00> : vector<8x256xf32>
    %109 = tpu.matmul %107, %108, %cst_59 {dimension_numbers = #tpu.dot_dimension_numbers<[1], [0], [0], [1], [0, 0, 1, 1], [], []>} : vector<8x128xf32>, vector<128x256xf32>, vector<8x256xf32> -> vector<8x256xf32>
    %cst_60 = arith.constant 0.000000e+00 : f32
    %110 = vector.broadcast %cst_60 : f32 to vector<8x256xf32>
    %111 = arith.cmpf ogt, %109, %110 : vector<8x256xf32>
    %cst_61 = arith.constant 0.00999999977 : f32
    %112 = vector.broadcast %cst_61 : f32 to vector<8x256xf32>
    %113 = arith.mulf %112, %109 : vector<8x256xf32>
    %114 = arith.select %111, %109, %113 : vector<8x256xi1>, vector<8x256xf32>
    %c0_62 = arith.constant 0 : index
    %c0_63 = arith.constant 0 : index
    %c0_64 = arith.constant 0 : index
    %115 = vector.load %arg5[%c0_62, %c0_63, %c0_64] : memref<1x8x256xf32, #tpu.memory_space<vmem>>, vector<1x8x256xf32>
    %116 = vector.shape_cast %115 : vector<1x8x256xf32> to vector<8x256xf32>
    %117 = vector.shape_cast %114 : vector<8x256xf32> to vector<1x8x256xf32>
    tpu.vector_store %arg5[%c0_62, %c0_63, %c0_64], %117 {strides = array<i32>} : memref<1x8x256xf32, #tpu.memory_space<vmem>>, vector<1x8x256xf32>,
    return
  }
  func.func @transform_0(%arg0: i32) -> (i32, i32, i32) {
    %c0_i32 = arith.constant 0 : i32
    %c0_i32_0 = arith.constant 0 : i32
    %c0_i32_1 = arith.constant 0 : i32
    return %arg0, %c0_i32, %c0_i32_0 : i32, i32, i32
  }
  func.func @transform_1(%arg0: i32) -> (i32, i32) {
    %c0_i32 = arith.constant 0 : i32
    %c0_i32_0 = arith.constant 0 : i32
    %c0_i32_1 = arith.constant 0 : i32
    return %c0_i32, %c0_i32_0 : i32, i32
  }
  func.func @transform_2(%arg0: i32) -> (i32, i32) {
    %c0_i32 = arith.constant 0 : i32
    %c0_i32_0 = arith.constant 0 : i32
    %c0_i32_1 = arith.constant 0 : i32
    return %c0_i32, %c0_i32_0 : i32, i32
  }
  func.func @transform_3(%arg0: i32) -> (i32, i32) {
    %c0_i32 = arith.constant 0 : i32
    %c0_i32_0 = arith.constant 0 : i32
    %c0_i32_1 = arith.constant 0 : i32
    return %c0_i32, %c0_i32_0 : i32, i32
  }
  func.func @transform_4(%arg0: i32) -> (i32, i32, i32) {
    %c0_i32 = arith.constant 0 : i32
    %c0_i32_0 = arith.constant 0 : i32
    %c0_i32_1 = arith.constant 0 : i32
    return %arg0, %c0_i32, %c0_i32_0 : i32, i32, i32
  }
}

</mosaic_0001>

<bundles_post_ra>
// kernel: tile.9
= control target key start
LH: loop header
LB: loop body
LE: loop exit
PB: predicated region body
PF: predicated region fallthrough
CT: control target
= control target key end

     0   :  { %s7_s6 = smov 3  ;;  %s21_s9 = smov 3  ;;  %vm4_vm0 = vcmask 130048   ;;  %vm11_vm1 = vcmask 1048448   ;;  %vm18_vm2 = vcmask 917248   ;;  %vm25_vm3 = vcmask 786048   ;;  %s131_s0 = inlined_call_operand.vmem [shape: s32[16,16], index: 0, kind: input, shape index: {}]   ;;  %s132_s1 = inlined_call_operand.vmem [shape: s32[1,256], index: 1, kind: output, shape index: {}]  }
   0x1   :  { %v69_v0 = vld [vmem:[%s131_s0 + $0x7] ss:$8 sm:%s7_s6]   ;;  %s84_s10 = smov 112   ;;  %v71_v1 = vld [vmem:[%s131_s0 + $0x5] ss:$8 sm:%s21_s9]   ;;  %s14_s13 = smov 3 }
   0x2   :  { %9 = vrot.lane.b32.xlu0 %v69_v0, %s84_s10  ;;  %s85_s14 = smov 80   ;;  %v70_v2 = vld [vmem:[%s131_s0 + $0x6] ss:$8 sm:%s14_s13]   ;;  %s28_s17 = smov 3  ;;  %vm32_vm4 = vcmask 654848   ;;  %vm39_vm5 = vcmask 523648  }
   0x3   :  { %23 = vrot.lane.b32.xlu1 %v71_v1, %s85_s14  ;;  %v72_v3 = vld [vmem:[%s131_s0 + $0x4] ss:$8 sm:%s28_s17]   ;;  %s35_s20 = smov 3  ;;  %s42_s21 = smov 3  ;;  %vm46_vm6 = vcmask 392448   ;;  %vm53_vm7 = vcmask 261248  }
   0x4   :  { %s86_s22 = smov 96   ;;  %s87_s23 = smov 64   ;;  %v73_v4 = vld [vmem:[%s131_s0 + $0x3] ss:$8 sm:%s35_s20]   ;;  %v74_v5 = vld [vmem:[%s131_s0 + $0x2] ss:$8 sm:%s42_s21]  }
   0x5   :  { %s2_s26 = smov 3  ;;  %s49_s29 = smov 3 }
   0x6   :  { %16 = vrot.lane.b32.xlu0 %v70_v2, %s86_s22  ;;  %v3_v6 = vld [vmem:[%s131_s0] ss:$8 sm:%s2_s26]   ;;  %s88_s3 = smov 48   ;;  %s89_s4 = smov 32  }
   0x7   :  { %30 = vrot.lane.b32.xlu1 %v72_v3, %s87_s23  ;;  %5 = vst.msk [vmem:[#allocation0] ss:$8 sm:$0x3] %vm4_vm0, %v3_v6   ;;  %v75_v7 = vld [vmem:[%s131_s0 + $0x1] ss:$8 sm:%s49_s29]   ;;  %s90_s0 = smov 16  }
   0xa   :  { %37 = vrot.lane.b32.xlu0 %v73_v4, %s88_s3 }
   0xb   :  { %44 = vrot.lane.b32.xlu1 %v74_v5, %s89_s4 }
   0xe   :  { %51 = vrot.lane.b32.xlu0 %v75_v7, %s90_s0 }
  0x74   :  { %v10_v8 = vpop.permute.xlu0 %9  }
  0x75   :  { %12 = vst.msk [vmem:[#allocation0] ss:$8 sm:$0x3] %vm11_vm1, %v10_v8   ;;  %v24_v9 = vpop.permute.xlu1 %23  }
  0x78   :  { %v17_v10 = vpop.permute.xlu0 %16  }
  0x79   :  { %19 = vst.msk [vmem:[#allocation0] ss:$8 sm:$0x3] %vm18_vm2, %v17_v10   ;;  %v31_v11 = vpop.permute.xlu1 %30  }
  0x7a   :  { %26 = vst.msk [vmem:[#allocation0] ss:$8 sm:$0x3] %vm25_vm3, %v24_v9  }
  0x7b   :  { %33 = vst.msk [vmem:[#allocation0] ss:$8 sm:$0x3] %vm32_vm4, %v31_v11  }
  0x7c   :  { %v38_v12 = vpop.permute.xlu0 %37  }
  0x7d   :  { %40 = vst.msk [vmem:[#allocation0] ss:$8 sm:$0x3] %vm39_vm5, %v38_v12   ;;  %v45_v13 = vpop.permute.xlu1 %44  }
  0x7e   :  { %47 = vst.msk [vmem:[#allocation0] ss:$8 sm:$0x3] %vm46_vm6, %v45_v13  }
  0x80   :  { %v52_v14 = vpop.permute.xlu0 %51  }
  0x81   :  { %54 = vst.msk [vmem:[#allocation0] ss:$8 sm:$0x3] %vm53_vm7, %v52_v14  }
  0x88   :  { %v59_v15 = vld [vmem:[#allocation0] sm:$0x1]  ;;  %v64_v16 = vld [vmem:[#allocation0 + $0x8] sm:$0x1] }
  0x89   :  { %62 = vst [vmem:[%s132_s1] sm:$0x1] %v59_v15  ;;  %76 = vst [vmem:[%s132_s1 + $0x1] sm:$0x1] %v64_v16 }

// kernel: conv_block_forward.1
= control target key start
LH: loop header
LB: loop body
LE: loop exit
PB: predicated region body
PF: predicated region fallthrough
CT: control target
= control target key end

     0   :  { %s828_s15 = smov 0   ;;  %s1081_s0 = inlined_call_operand.vmem [shape: f32[2,4,256], index: 0, kind: input, shape index: {}]   ;;  %s1082_s1 = inlined_call_operand.vmem [shape: f32[8,128], index: 1, kind: input, shape index: {}]   ;;  %s1083_s2 = inlined_call_operand.vmem [shape: f32[8,128], index: 2, kind: input, shape index: {}]   ;;  %s1084_s3 = inlined_call_operand.vmem [shape: s32[2,256], index: 3, kind: input, shape index: {}]   ;;  %s1085_s4 = inlined_call_operand.vmem [shape: f32[2,8,256], index: 4, kind: output, shape index: {}]  }
   0x1 LB: > { %s758_s16 = sadd.s32 4294967295, %s794_s15   ;;  %p762_p0 = scmp.ge.s32.totalorder %s794_s15, 1  ;;  %s794_s15 = sphi %s828_s15, %s14_s15  }
   0x2   : > { %p162_p1 = scmp.lt.s32.totalorder %s794_s15, 3 }
   0x4   : > { %p163_p2 = pnand %p762_p0, %p162_p1 }
   0x5   : > { %p188_p3 = scmp.lt.s32.totalorder (!%p163_p2), %s758_s16, 1  ;;  %s796_s21 = smov (!%p163_p2), 1  }
   0x6   : > { %166 = sbr.rel (%p163_p2) target bundleno = 943 (0x3af), region = 36  ;;  %s797_s22 = smov (!%p163_p2), 127  }
   0x7   : > { %s799_s23 = smov (!%p163_p2), 112   ;;  %s800_s24 = smov (!%p163_p2), 16  }
   0xb   : > { %s1103_s16 = smov (!%p188_p3, %s758_s16), 1  ;;  %v798_v2 = vmov 0.0   ;;  %v237_v3 = vlaneseq  ;;  %v198_v4 = vld [vmem:[%s1084_s3] ss:$2 sm:$0x3]  ;;  %v801_v9 = vmov 0  }
   0xc   : > { %s770_s17 = sshll.u32 %s1103_s16, 3  ;;  %429 = vmatprep.subr.mxu0 %v798_v2  ;;  %205 = vst [vmem:[#allocation2 + $0x40] sm:$0xff] %v798_v2  ;;  %206 = vst [vmem:[#allocation2 + $0x48] sm:$0xff] %v798_v2  ;;  %493 = vmatprep.mubr.f32.mxu0 %v798_v2  ;;  %vm202_vm0 = vcmp.eq.s32.totalorder %v198_v4, 15  ;;  %vm201_vm1 = vcmp.eq.s32.totalorder %v198_v4, 0  ;;  %v802_v13 = vmov 1.0  }
   0xd   : > { %s192_s20 = scalar_lea.vmem %s1081_s0, %s770_s17  ;;  %215 = vst [vmem:[#allocation2 + $0x90] sm:$0xff] %v798_v2  ;;  %216 = vst [vmem:[#allocation2 + $0x98] sm:$0xff] %v798_v2  ;;  %430 = vmatpush1.msra.mxu0 %v798_v2  ;;  %624 = vmatprep.subr.mxu1 %v798_v2  ;;  %v251_v5 = vshrl.u32 %v237_v3, 7  ;;  %v767_v6 = vld [vmem:[%s1084_s3 + $0x1] ss:$2 sm:$0x3] }
   0xe   : > { %v229_v0 = vld [vmem:[%s192_s20] sm:$0xff]  ;;  %431 = vmatprep.subr.mxu0 %v798_v2  ;;  %625 = vmatpush1.msra.mxu1 %v798_v2  ;;  %v262_v10 = vsel %vm202_vm0, 1, %v801_v9  ;;  %v249_v11 = vsel %vm201_vm1, 1, %v801_v9  ;;  %vm391_vm2 = vcmp.lt.s32.totalorder %v237_v3, 256  ;;  %v856_v12 = vand.u32 127, %v237_v3  ;;  %s771_s7 = sshll.u32 %s1103_s16, 4 }
   0xf   : > { %242 = vrot.lane.b32.xlu1 %v229_v0, %s796_s21  ;;  %351 = vst [vmem:[#allocation2 + $0x20] sm:$0xf] %v229_v0  ;;  %233 = vrot.lane.b32.xlu0 %v229_v0, %s797_s22  ;;  %v231_v1 = vcombine.high %v229_v0, %v229_v0  ;;  %v256_v7 = vsub.s32 1, %v251_v5  ;;  %v252_v8 = vsub.s32 0, %v251_v5  ;;  %vm203_vm3 = vcmp.eq.s32.totalorder %v767_v6, 0  ;;  %s197_s10 = scalar_lea.vmem %s1085_s4, %s771_s7 }
  0x10   : > { %432 = vmatpush1.msra.mxu0 %v798_v2  ;;  %626 = vmatprep.subr.mxu1 %v798_v2  ;;  %vm204_vm4 = vcmp.eq.s32.totalorder %v767_v6, 15  ;;  %394 = vst.msk [vmem:[#allocation2 + $0x44] ss:$8 sm:$0x3] %vm391_vm2, %v802_v13  ;;  %v289_v20 = vsel %vm203_vm3, 1, %v801_v9  ;;  %vm246_vm5 = vcmp.lt.s32.totalorder %v856_v12, 1 }
  0x11   : > { %352 = vst [vmem:[#allocation2 + $0x28] sm:$0xf] %v231_v1  ;;  %433 = vmatprep.subr.mxu0 %v798_v2  ;;  %627 = vmatpush1.msra.mxu1 %v798_v2  ;;  %589 = vst.msk [vmem:[#allocation2 + $0x90] ss:$8 sm:$0x3] %vm391_vm2, %v802_v13  ;;  %v270_v14 = vrot.slane %v262_v10, %v256_v7  ;;  %v266_v15 = vrot.slane %v262_v10, %v252_v8  ;;  %v302_v21 = vsel %vm204_vm4, 1, %v801_v9 }
  0x12   : > { %434 = vmatpush1.msra.mxu0 %v798_v2  ;;  %628 = vmatprep.subr.mxu1 %v798_v2  ;;  %v257_v16 = vrot.slane %v249_v11, %v256_v7  ;;  %v253_v17 = vrot.slane %v249_v11, %v252_v8  ;;  %vm239_vm6 = vcmp.lt.s32.totalorder %v856_v12, 127  ;;  %v293_v28 = vrot.slane %v289_v20, %v252_v8 }
  0x13   : > { %244 = vrot.lane.b32.xlu1 %v231_v1, %s796_s21  ;;  %235 = vrot.lane.b32.xlu0 %v231_v1, %s797_s22  ;;  %vm860_vm7 = vcmp.eq.s32.totalorder %v270_v14, 1  ;;  %vm864_vm8 = vcmp.eq.s32.totalorder %v266_v15, 1  ;;  %v297_v29 = vrot.slane %v289_v20, %v256_v7  ;;  %v306_v30 = vrot.slane %v302_v21, %v252_v8 }
  0x14   : > { %435 = vmatprep.subr.mxu0 %v798_v2  ;;  %629 = vmatpush1.msra.mxu1 %v798_v2  ;;  %vm868_vm9 = vcmp.eq.s32.totalorder %v257_v16, 1  ;;  %vm872_vm10 = vcmp.eq.s32.totalorder %v253_v17, 1  ;;  %v310_v31 = vrot.slane %v302_v21, %v256_v7  ;;  %vm279_vm11 = vcmp.lt.s32.totalorder %v856_v12, 112 }
  0x15   : > { %436 = vmatpush1.msra.mxu0 %v798_v2  ;;  %630 = vmatprep.subr.mxu1 %v798_v2  ;;  %vm286_vm12 = vcmp.lt.s32.totalorder %v856_v12, 16  ;;  %vm896_vm13 = vcmp.eq.s32.totalorder %v293_v28, 1  ;;  %vm900_vm14 = vcmp.eq.s32.totalorder %v297_v29, 1  ;;  %vm910_vm15 = vcmp.eq.s32.totalorder %v306_v30, 1  ;;  %v591_v12 = vld [vmem:[%s1083_s2] sm:$0xff] }
  0x16   : > { %437 = vmatprep.subr.mxu0 %v798_v2  ;;  %631 = vmatpush1.msra.mxu1 %v798_v2  ;;  %vm914_vm0 = vcmp.eq.s32.totalorder %v310_v31, 1 }
  0x17   : > { %329 = vrot.lane.b32.xlu1 %v231_v1, %s799_s23  ;;  %327 = vrot.lane.b32.xlu0 %v229_v0, %s799_s23 }
  0x18   : > { %438 = vmatpush1.msra.mxu0 %v798_v2  ;;  %632 = vmatprep.subr.mxu1 %v798_v2 }
  0x19   : > { %439 = vmatprep.subr.mxu0 %v798_v2  ;;  %633 = vmatpush1.msra.mxu1 %v798_v2 }
  0x1a   : > { %440 = vmatpush1.msra.mxu0 %v798_v2  ;;  %634 = vmatprep.subr.mxu1 %v798_v2 }
  0x1b   : > { %335 = vrot.lane.b32.xlu1 %v231_v1, %s800_s24  ;;  %333 = vrot.lane.b32.xlu0 %v229_v0, %s800_s24 }
  0x1c   : > { %441 = vmatprep.subr.mxu0 %v798_v2  ;;  %635 = vmatpush1.msra.mxu1 %v798_v2 }
  0x1d   : > { %442 = vmatpush1.msra.mxu0 %v798_v2  ;;  %688 = vmatprep.mubr.f32.mxu1 %v798_v2 }
  0x1e   : > { %443 = vmatprep.subr.mxu0 %v798_v2 }
  0x1f   : > { %444 = vmatpush1.msra.mxu0 %v798_v2 }
  0x20   : > { %445 = vmatprep.subr.mxu0 %v798_v2 }
  0x21   : > { %446 = vmatpush1.msra.mxu0 %v798_v2 }
  0x22   : > { %447 = vmatprep.subr.mxu0 %v798_v2 }
  0x23   : > { %448 = vmatpush1.msra.mxu0 %v798_v2 }
  0x24   : > { %449 = vmatprep.subr.mxu0 %v798_v2 }
  0x25   : > { %450 = vmatpush1.msra.mxu0 %v798_v2 }
  0x81   : > { %v243_v18 = vpop.permute.xlu1 %242  ;;  %v234_v19 = vpop.permute.xlu0 %233 }
  0x85   : > { %v245_v26 = vpop.permute.xlu1 %244  ;;  %v236_v27 = vpop.permute.xlu0 %235 }
  0x86   : > { %v247_v32 = vsel %vm246_vm5, %v243_v18, %v245_v26  ;;  %v248_v33 = vsel %vm246_vm5, %v245_v26, %v243_v18  ;;  %v240_v34 = vsel %vm239_vm6, %v234_v19, %v236_v27  ;;  %v241_v35 = vsel %vm239_vm6, %v236_v27, %v234_v19 }
  0x87   : > { %v274_v36 = vsel %vm860_vm7, %v247_v32, %v241_v35  ;;  %v273_v37 = vsel %vm864_vm8, %v248_v33, %v240_v34  ;;  %v261_v38 = vsel %vm868_vm9, %v241_v35, %v247_v32  ;;  %v260_v39 = vsel %vm872_vm10, %v240_v34, %v248_v33 }
  0x88   : > { %363 = vrot.lane.b32.xlu1 %v274_v36, %s799_s23  ;;  %v382_v40 = vrot.slane %v274_v36, 4  ;;  %361 = vrot.lane.b32.xlu0 %v273_v37, %s799_s23  ;;  %v381_v41 = vrot.slane %v273_v37, 4  ;;  %v320_v42 = vrot.slane %v261_v38, 4  ;;  %v319_v43 = vrot.slane %v260_v39, 4 }
  0x89   : > { %v330_v44 = vpop.permute.xlu1 %329  ;;  %v328_v45 = vpop.permute.xlu0 %327 }
  0x8a   : > { %386 = vst [vmem:[#allocation2 + $0x28] sm:$0xf0] %v382_v40  ;;  %385 = vst [vmem:[#allocation2 + $0x20] sm:$0xf0] %v381_v41  ;;  %v331_v48 = vsel %vm279_vm11, %v328_v45, %v330_v44  ;;  %v332_v49 = vsel %vm279_vm11, %v330_v44, %v328_v45 }
  0x8b   : > { %324 = vst [vmem:[#allocation2 + $0x18] sm:$0xf0] %v320_v42  ;;  %323 = vst [vmem:[#allocation2 + $0x10] sm:$0xf0] %v319_v43 }
  0x8c   : > { %369 = vrot.lane.b32.xlu1 %v274_v36, %s800_s24  ;;  %367 = vrot.lane.b32.xlu0 %v273_v37, %s800_s24 }
  0x8d   : > { %v336_v52 = vpop.permute.xlu1 %335  ;;  %v334_v53 = vpop.permute.xlu0 %333 }
  0x8e   : > { %v337_v54 = vsel %vm286_vm12, %v334_v53, %v336_v52  ;;  %v338_v55 = vsel %vm286_vm12, %v336_v52, %v334_v53  ;;  %v610_v52 = vld [vmem:[#allocation2 + $0x90] sm:$0xff] }
  0x8f   : > { %v339_v56 = vsel %vm896_vm13, %v331_v48, %v338_v55  ;;  %v340_v57 = vsel %vm900_vm14, %v332_v49, %v337_v54  ;;  %v341_v58 = vsel %vm910_vm15, %v338_v55, %v331_v48  ;;  %v342_v59 = vsel %vm914_vm0, %v337_v54, %v332_v49  ;;  %v611_v49 = vld [vmem:[#allocation2 + $0x98] sm:$0xff] }
  0x90   : > { %277 = vrot.lane.b32.xlu1 %v261_v38, %s799_s23  ;;  %275 = vrot.lane.b32.xlu0 %v260_v39, %s799_s23  ;;  %v345_v60 = vrot.slane %v339_v56, 4  ;;  %v346_v61 = vrot.slane %v340_v57, 4  ;;  %v355_v62 = vrot.slane %v341_v58, 4  ;;  %v356_v63 = vrot.slane %v342_v59, 4 }
  0x91   : > { %v402_v33 = vld [vmem:[#allocation2 + $0x28] sm:$0xff]  ;;  %v401_v34 = vld [vmem:[#allocation2 + $0x20] sm:$0xff]  ;;  %636 = vmatprep.subr.mxu1 %v611_v49 }
  0x92   : > { %349 = vst [vmem:[#allocation2] sm:$0xf0] %v345_v60  ;;  %350 = vst [vmem:[#allocation2 + $0x8] sm:$0xf0] %v346_v61  ;;  %637 = vmatpush1.msra.mxu1 %v610_v52 }
  0x93   : > { %359 = vst [vmem:[#allocation2 + $0x30] sm:$0xf0] %v355_v62  ;;  %360 = vst [vmem:[#allocation2 + $0x38] sm:$0xf0] %v356_v63 }
  0x94   : > { %284 = vrot.lane.b32.xlu1 %v261_v38, %s800_s24  ;;  %282 = vrot.lane.b32.xlu0 %v260_v39, %s800_s24  ;;  %v396_v38 = vld [vmem:[%s1082_s1] sm:$0xff] }
  0xfa   : > { %v364_v0 = vpop.permute.xlu1 %363  ;;  %v362_v1 = vpop.permute.xlu0 %361 }
  0xfb   : > { %v365_v4 = vsel %vm279_vm11, %v362_v1, %v364_v0  ;;  %v366_v5 = vsel %vm279_vm11, %v364_v0, %v362_v1 }
  0xfe   : > { %v370_v2 = vpop.permute.xlu1 %369  ;;  %v368_v3 = vpop.permute.xlu0 %367 }
  0xff   : > { %v371_v6 = vsel %vm286_vm12, %v368_v3, %v370_v2  ;;  %v372_v7 = vsel %vm286_vm12, %v370_v2, %v368_v3 }
 0x100   : > { %v373_v8 = vsel %vm896_vm13, %v365_v4, %v372_v7  ;;  %v374_v9 = vsel %vm900_vm14, %v366_v5, %v371_v6  ;;  %v375_v10 = vsel %vm910_vm15, %v372_v7, %v365_v4  ;;  %v376_v11 = vsel %vm914_vm0, %v371_v6, %v366_v5 }
 0x101   : > { %377 = vst [vmem:[#allocation2 + $0x10] sm:$0xf] %v373_v8  ;;  %378 = vst [vmem:[#allocation2 + $0x18] sm:$0xf] %v374_v9 }
 0x102   : > { %387 = vst [vmem:[#allocation2 + $0x40] sm:$0xf] %v375_v10  ;;  %388 = vst [vmem:[#allocation2 + $0x48] sm:$0xf] %v376_v11  ;;  %v278_v13 = vpop.permute.xlu1 %277  ;;  %v276_v14 = vpop.permute.xlu0 %275 }
 0x103   : > { %v280_v17 = vsel %vm279_vm11, %v276_v14, %v278_v13  ;;  %v281_v18 = vsel %vm279_vm11, %v278_v13, %v276_v14 }
 0x106   : > { %v285_v15 = vpop.permute.xlu1 %284  ;;  %v283_v16 = vpop.permute.xlu0 %282 }
 0x107   : > { %v287_v19 = vsel %vm286_vm12, %v283_v16, %v285_v15  ;;  %v288_v20 = vsel %vm286_vm12, %v285_v15, %v283_v16 }
 0x108   : > { %v300_v21 = vsel %vm896_vm13, %v280_v17, %v288_v20  ;;  %v301_v26 = vsel %vm900_vm14, %v281_v18, %v287_v19  ;;  %v313_v27 = vsel %vm910_vm15, %v288_v20, %v280_v17  ;;  %v314_v28 = vsel %vm914_vm0, %v287_v19, %v281_v18  ;;  %v400_v35 = vld [vmem:[#allocation2 + $0x18] sm:$0xff]  ;;  %v399_v36 = vld [vmem:[#allocation2 + $0x10] sm:$0xff] }
 0x109   : > { %v406_v29 = vld [vmem:[#allocation2 + $0x48] sm:$0xff]  ;;  %v405_v30 = vld [vmem:[#allocation2 + $0x40] sm:$0xff]  ;;  %315 = vst [vmem:[#allocation2] sm:$0xf] %v300_v21  ;;  %316 = vst [vmem:[#allocation2 + $0x8] sm:$0xf] %v301_v26 }
 0x10a   : > { %325 = vst [vmem:[#allocation2 + $0x30] sm:$0xf] %v313_v27  ;;  %326 = vst [vmem:[#allocation2 + $0x38] sm:$0xf] %v314_v28  ;;  %451 = vmatprep.subr.mxu0 %v406_v29 }
 0x10b   : > { %452 = vmatpush1.msra.mxu0 %v405_v30 }
 0x110   : > { %v398_v37 = vld [vmem:[#allocation2 + $0x8] sm:$0xff]  ;;  %v397_v39 = vld [vmem:[#allocation2] sm:$0xff] }
 0x111   : > { %v404_v31 = vld [vmem:[#allocation2 + $0x38] sm:$0xff]  ;;  %v403_v32 = vld [vmem:[#allocation2 + $0x30] sm:$0xff] }
 0x112   : > { %453 = vmatprep.subr.mxu0 %v404_v31 }
 0x113   : > { %454 = vmatpush1.msra.mxu0 %v403_v32 }
 0x114   : > { %455 = vmatprep.subr.mxu0 %v402_v33 }
 0x115   : > { %456 = vmatpush1.msra.mxu0 %v401_v34 }
 0x116   : > { %457 = vmatprep.subr.mxu0 %v400_v35 }
 0x117   : > { %458 = vmatpush1.msra.mxu0 %v399_v36 }
 0x118   : > { %459 = vmatprep.subr.mxu0 %v398_v37 }
 0x119   : > { %460 = vmatpush1.msra.mxu0 %v397_v39 }
 0x11a   : > { %494 = vmatmul.mubr.f32.vlgmr.msra.gmra.mxu0 %v396_v38 }
 0x1da   : > { %v495_v40 = vpop.f32.mrf.mxu0 }
 0x1db   : > { %vm500_vm1 = vcmp.gt.f32.partialorder %v495_v40, 0.0  ;;  %v502_v41 = vmul.f32 0.01, %v495_v40 }
 0x1dc   : > { %v497_v42 = vpop.f32.mrf.mxu0 }
 0x1dd   : > { %v969_v43 = vsel %vm500_vm1, %v495_v40, %v502_v41  ;;  %vm501_vm2 = vcmp.gt.f32.partialorder %v497_v42, 0.0  ;;  %v503_v44 = vmul.f32 0.01, %v497_v42 }
 0x1de   : > { %562 = vst [vmem:[#allocation2 + $0x40] sm:$0xff] %v969_v43  ;;  %506 = vrot.lane.b32.xlu0 %v969_v43, %s797_s22 }
 0x1df   : > { %v974_v45 = vsel %vm501_vm2, %v497_v42, %v503_v44 }
 0x1e0   : > { %563 = vst [vmem:[#allocation2 + $0x48] sm:$0xff] %v974_v45  ;;  %508 = vrot.lane.b32.xlu1 %v974_v45, %s797_s22 }
 0x1e2   : > { %512 = vrot.lane.b32.xlu0 %v969_v43, %s796_s21 }
 0x1e4   : > { %514 = vrot.lane.b32.xlu1 %v974_v45, %s796_s21 }
 0x1e6   : > { %544 = vrot.lane.b32.xlu0 %v969_v43, %s799_s23 }
 0x1e8   : > { %546 = vrot.lane.b32.xlu1 %v974_v45, %s799_s23 }
 0x1ea   : > { %550 = vrot.lane.b32.xlu0 %v969_v43, %s800_s24 }
 0x1ec   : > { %552 = vrot.lane.b32.xlu1 %v974_v45, %s800_s24 }
 0x250   : > { %v507_v48 = vpop.permute.xlu0 %506 }
 0x252   : > { %v509_v53 = vpop.permute.xlu1 %508 }
 0x253   : > { %v510_v56 = vsel %vm239_vm6, %v507_v48, %v509_v53  ;;  %v511_v57 = vsel %vm239_vm6, %v509_v53, %v507_v48 }
 0x254   : > { %v513_v54 = vpop.permute.xlu0 %512 }
 0x256   : > { %v515_v55 = vpop.permute.xlu1 %514 }
 0x257   : > { %v516_v58 = vsel %vm246_vm5, %v513_v54, %v515_v55  ;;  %v517_v59 = vsel %vm246_vm5, %v515_v55, %v513_v54 }
 0x258   : > { %v545_v60 = vpop.permute.xlu0 %544  ;;  %v520_v61 = vsel %vm864_vm8, %v517_v59, %v510_v56  ;;  %v521_v62 = vsel %vm860_vm7, %v516_v58, %v511_v57  ;;  %v1005_v63 = vsel %vm872_vm10, %v510_v56, %v517_v59  ;;  %v519_v0 = vsel %vm868_vm9, %v511_v57, %v516_v58 }
 0x259   : > { %566 = vrot.lane.b32.xlu0 %v520_v61, %s799_s23  ;;  %568 = vrot.lane.b32.xlu1 %v521_v62, %s799_s23  ;;  %540 = vst [vmem:[#allocation2 + $0x30] sm:$0xff] %v1005_v63  ;;  %541 = vst [vmem:[#allocation2 + $0x38] sm:$0xff] %v519_v0 }
 0x25a   : > { %v547_v1 = vpop.permute.xlu1 %546 }
 0x25b   : > { %v548_v25 = vsel %vm279_vm11, %v545_v60, %v547_v1  ;;  %v549_v24 = vsel %vm279_vm11, %v547_v1, %v545_v60 }
 0x25c   : > { %v551_v22 = vpop.permute.xlu0 %550 }
 0x25d   : > { %572 = vrot.lane.b32.xlu0 %v520_v61, %s800_s24  ;;  %574 = vrot.lane.b32.xlu1 %v521_v62, %s800_s24 }
 0x25e   : > { %v553_v23 = vpop.permute.xlu1 %552 }
 0x25f   : > { %v554_v2 = vsel %vm286_vm12, %v551_v22, %v553_v23  ;;  %v555_v3 = vsel %vm286_vm12, %v553_v23, %v551_v22 }
 0x260   : > { %v556_v4 = vsel %vm896_vm13, %v548_v25, %v555_v3  ;;  %v557_v5 = vsel %vm900_vm14, %v549_v24, %v554_v2  ;;  %v558_v6 = vsel %vm910_vm15, %v555_v3, %v548_v25  ;;  %v559_v7 = vsel %vm914_vm0, %v554_v2, %v549_v24 }
 0x261   : > { %560 = vst [vmem:[#allocation2 + $0x10] sm:$0xff] %v556_v4  ;;  %561 = vst [vmem:[#allocation2 + $0x18] sm:$0xff] %v557_v5  ;;  %522 = vrot.lane.b32.xlu0 %v1005_v63, %s799_s23  ;;  %524 = vrot.lane.b32.xlu1 %v519_v0, %s799_s23 }
 0x265   : > { %528 = vrot.lane.b32.xlu0 %v1005_v63, %s800_s24  ;;  %530 = vrot.lane.b32.xlu1 %v519_v0, %s800_s24 }
 0x2cb   : > { %v567_v8 = vpop.permute.xlu0 %566  ;;  %v569_v9 = vpop.permute.xlu1 %568 }
 0x2cc   : > { %v570_v13 = vsel %vm279_vm11, %v567_v8, %v569_v9  ;;  %v571_v14 = vsel %vm279_vm11, %v569_v9, %v567_v8 }
 0x2cf   : > { %v573_v10 = vpop.permute.xlu0 %572  ;;  %v575_v11 = vpop.permute.xlu1 %574 }
 0x2d0   : > { %v576_v15 = vsel %vm286_vm12, %v573_v10, %v575_v11  ;;  %v577_v16 = vsel %vm286_vm12, %v575_v11, %v573_v10 }
 0x2d1   : > { %v578_v17 = vsel %vm896_vm13, %v570_v13, %v577_v16  ;;  %v579_v18 = vsel %vm900_vm14, %v571_v14, %v576_v15  ;;  %v580_v19 = vsel %vm910_vm15, %v577_v16, %v570_v13  ;;  %v581_v20 = vsel %vm914_vm0, %v576_v15, %v571_v14 }
 0x2d2   : > { %582 = vst [vmem:[#allocation2 + $0x20] sm:$0xff] %v578_v17  ;;  %583 = vst [vmem:[#allocation2 + $0x28] sm:$0xff] %v579_v18  ;;  %638 = vmatprep.subr.mxu1 %v581_v20 }
 0x2d3   : > { %v523_v21 = vpop.permute.xlu0 %522  ;;  %v525_v26 = vpop.permute.xlu1 %524  ;;  %639 = vmatpush1.msra.mxu1 %v580_v19 }
 0x2d4   : > { %640 = vmatprep.subr.mxu1 %v559_v7  ;;  %v526_v29 = vsel %vm279_vm11, %v523_v21, %v525_v26  ;;  %v527_v30 = vsel %vm279_vm11, %v525_v26, %v523_v21 }
 0x2d5   : > { %641 = vmatpush1.msra.mxu1 %v558_v6 }
 0x2d7   : > { %v529_v27 = vpop.permute.xlu0 %528  ;;  %v531_v28 = vpop.permute.xlu1 %530 }
 0x2d8   : > { %v532_v31 = vsel %vm286_vm12, %v529_v27, %v531_v28  ;;  %v533_v32 = vsel %vm286_vm12, %v531_v28, %v529_v27 }
 0x2d9   : > { %v534_v33 = vsel %vm896_vm13, %v526_v29, %v533_v32  ;;  %v535_v34 = vsel %vm900_vm14, %v527_v30, %v532_v31  ;;  %v536_v35 = vsel %vm910_vm15, %v533_v32, %v526_v29  ;;  %v537_v36 = vsel %vm914_vm0, %v532_v31, %v527_v30 }
 0x2da   : > { %538 = vst [vmem:[#allocation2] sm:$0xff] %v534_v33  ;;  %539 = vst [vmem:[#allocation2 + $0x8] sm:$0xff] %v535_v34  ;;  %642 = vmatprep.subr.mxu1 %v537_v36 }
 0x2db   : > { %643 = vmatpush1.msra.mxu1 %v536_v35 }
 0x2dc   : > { %644 = vmatprep.subr.mxu1 %v521_v62 }
 0x2dd   : > { %645 = vmatpush1.msra.mxu1 %v520_v61 }
 0x2de   : > { %646 = vmatprep.subr.mxu1 %v974_v45 }
 0x2df   : > { %647 = vmatpush1.msra.mxu1 %v969_v43 }
 0x2e0   : > { %648 = vmatprep.subr.mxu1 %v519_v0 }
 0x2e1   : > { %649 = vmatpush1.msra.mxu1 %v1005_v63 }
 0x2e2   : > { %650 = vmatprep.subr.mxu1 %v579_v18 }
 0x2e3   : > { %651 = vmatpush1.msra.mxu1 %v578_v17 }
 0x2e4   : > { %652 = vmatprep.subr.mxu1 %v557_v5 }
 0x2e5   : > { %653 = vmatpush1.msra.mxu1 %v556_v4 }
 0x2e6   : > { %654 = vmatprep.subr.mxu1 %v535_v34 }
 0x2e7   : > { %655 = vmatpush1.msra.mxu1 %v534_v33 }
 0x2e8   : > { %689 = vmatmul.mubr.f32.vlgmr.msra.gmra.mxu1 %v591_v12 }
 0x3a8   : > { %v690_v46 = vpop.f32.mrf.mxu1 }
 0x3a9   : > { %vm695_vm3 = vcmp.gt.f32.partialorder %v690_v46, 0.0  ;;  %v697_v47 = vmul.f32 0.01, %v690_v46 }
 0x3aa   : > { %v692_v50 = vpop.f32.mrf.mxu1 }
 0x3ab   : > { %v699_v51 = vsel %vm695_vm3, %v690_v46, %v697_v47  ;;  %vm696_vm4 = vcmp.gt.f32.partialorder %v692_v50, 0.0  ;;  %v698_v37 = vmul.f32 0.01, %v692_v50 }
 0x3ac   : > { %701 = vst [vmem:[%s197_s10] sm:$0xff] %v699_v51 }
 0x3ad   : > { %v700_v38 = vsel %vm696_vm4, %v692_v50, %v698_v37 }
 0x3ae   : > { %702 = vst [vmem:[%s197_s10 + $0x8] sm:$0xff] %v700_v38 }
 0x3af PF: > { %s14_s15 = sadd.s32 1, %s794_s15  }
 0x3b0   : > { %p11_p4 = scmp.ge.s32.totalorder %s14_s15, 4  }
 0x3b2   :  { %13 = sbr.rel (!%p11_p4) target bundleno = 1 (0x1), region = 69 }

</bundles_post_ra>
